<compile_context>
chip_gen: v7x
topology: tpu7x:2x2x1
jax: 0.10.0
libtpu: 0.0.40
codegen_flags: <defaults>
</compile_context>

<pallas_src>
import functools

import numpy as np
import jax
import jax.numpy as jnp
from jax import lax
from jax.experimental import pallas as pl
from jax.experimental.pallas import tpu as pltpu


def _round_up(x, m):
    return ((x + m - 1) // m) * m


def _cdiv(a, b):
    return -(-a // b)


def _vmem_capacity_bytes():
    try:
        cap = getattr(pltpu.get_tpu_info(), "vmem_capacity_bytes", None)
        if cap:
            return int(cap)
    except Exception:
        pass
    return 64 * 1024 * 1024  # conservative default (v7x per-core VMEM)


def _choose_lane_dim(s_total, c_max=512):
    """Pick C (multiple of 128, <= c_max).  Prefer exact divisors of h*w so the
    reshape to (R, C) is free (no jnp.pad HBM pass); otherwise minimize pad."""
    c_cap = max(128, min(_round_up(s_total, 128), c_max))
    candidates = list(range(128, c_cap + 1, 128))
    exact = [c for c in candidates if s_total % c == 0]
    if exact:
        return max(exact)
    best_c, best_pad = candidates[0], None
    for c in candidates:
        pad = _cdiv(s_total, c) * c - s_total
        if best_pad is None or pad <= best_pad:   # ties -> larger C
            best_c, best_pad = c, pad
    return best_c


def _flow_entropy_kernel(x_ref, o_ref, *, d, sub, inv_log_d):
    # x_ref: (1, D, TR, C)   o_ref: (1, TR, C)
    tr = x_ref.shape[2]
    n_sub = tr // sub            # wrapper guarantees `sub` divides `tr`

    @pl.loop(0, n_sub)
    def _(rchunk):
        r0 = pl.multiple_of(rchunk * sub, sub)
        rows = pl.ds(r0, sub)

        # Pass 1: running max over D (exact in the input dtype; max never rounds).
        def max_body(j, m):
            return jnp.maximum(m, x_ref[0, j, rows, :])

        m = lax.fori_loop(1, d, max_body, x_ref[0, 0, rows, :],
                          unroll=True).astype(jnp.float32)

        # Pass 2: s = sum_j exp(x_j - m),  t = sum_j exp(x_j - m) * (x_j - m).
        # Each D-slice is cast to f32 *before* the subtraction (bf16-safe).
        def acc_body(j, st):
            s, t = st
            xs = x_ref[0, j, rows, :].astype(jnp.float32) - m
            e = jnp.exp(xs)
            return s + e, t + e * xs

        zero = jnp.zeros_like(m)
        s, t = lax.fori_loop(0, d, acc_body, (zero, zero), unroll=True)

        # H = log(s) - t/s (the max shift cancels), normalized by 1/log(D).
        inv_s = pl.reciprocal(s, approx=True)
        inv_s = inv_s * (2.0 - s * inv_s)        # one Newton step -> ~f32 accuracy
        ent = (jnp.log(s) - t * inv_s) * jnp.float32(inv_log_d)
        o_ref[0, rows, :] = ent.astype(o_ref.dtype)


def flow_entropy(x, eps=1e-9):
    """x: (batch, du, dv, h, w) -> (batch, h, w).

    `eps` is kept for interface parity with the PyTorch module; with the
    algebraic entropy form the clamp is a no-op to within ~2e-8.
    """
    del eps
    batch, du, dv, h, w = x.shape
    d = du * dv
    s_total = h * w
    itemsize = x.dtype.itemsize

    # TODO(synk): d == du*dv == 1 divides by log(1) == 0 in the PyTorch reference
    # too; that degenerate case is mathematically undefined.
    inv_log_d = float(1.0 / np.log(d)) if d > 1 else float("inf")

    # ---- lane-dense spatial layout -------------------------------------
    c = _choose_lane_dim(s_total)
    r = _cdiv(s_total, c)
    s_pad = r * c

    x_flat = x.reshape(batch, d, s_total)
    if s_pad != s_total:
        # Minimal pad (pad fraction already minimized in _choose_lane_dim).
        x_flat = jnp.pad(x_flat, ((0, 0), (0, 0), (0, s_pad - s_total)))
    x4 = x_flat.reshape(batch, d, r, c)

    # ---- generation-aware tiling ---------------------------------------
    vmem_cap = _vmem_capacity_bytes()
    budget = vmem_cap // 2                        # scoped-VMEM request
    target_in_bytes = min(8 * 1024 * 1024, budget // 4)   # ~4-8 MiB per step

    if r >= 8:
        tr = max(8, (target_in_bytes // (d * c * itemsize)) // 8 * 8)
        tr = int(min(tr, (r // 8) * 8))           # multiple of 8, never > R
        sub = 8
    else:
        tr = int(r)                               # tiny problem: full row dim
        sub = tr

    n_row = _cdiv(r, tr)
    # v7x has 2 TensorCores: nudge row tiling so the parallel grid is even.
    if (batch * n_row) % 2 == 1 and tr > 8:
        tr_alt = min(max(8, _round_up(_cdiv(r, n_row + 1), 8)), (r // 8) * 8)
        n_alt = _cdiv(r, tr_alt)
        if (batch * n_alt) % 2 == 0:
            tr, n_row = tr_alt, n_alt

    kernel = functools.partial(_flow_entropy_kernel, d=d, sub=sub,
                               inv_log_d=inv_log_d)

    cost = pl.CostEstimate(
        flops=int(7 * batch * d * s_pad),
        transcendentals=int(batch * d * s_pad + 2 * batch * s_pad),
        bytes_accessed=int((batch * d * s_pad + batch * s_pad) * itemsize),
    )

    # Note: when R % TR != 0 the boundary block reads unspecified rows; those
    # rows only feed per-lane math and their output rows are dropped on
    # write-back, so valid lanes are unaffected.
    out_pad = pl.pallas_call(
        kernel,
        out_shape=jax.ShapeDtypeStruct((batch, r, c), x.dtype),
        grid_spec=pltpu.PrefetchScalarGridSpec(
            num_scalar_prefetch=0,
            grid=(batch, n_row),
            in_specs=[pl.BlockSpec((1, d, tr, c), lambda b, i: (b, 0, i, 0))],
            out_specs=pl.BlockSpec((1, tr, c), lambda b, i: (b, i, 0)),
        ),
        compiler_params=pltpu.CompilerParams(
            dimension_semantics=("parallel", "parallel"),
            vmem_limit_bytes=int(budget),
        ),
        cost_estimate=cost,
    )(x4)

    if s_pad == s_total:
        return out_pad.reshape(batch, h, w)
    return out_pad.reshape(batch, s_pad)[:, :s_total].reshape(batch, h, w)


def _flow_entropy_ref(x, eps=1e-9):
    batch, du, dv, h, w = x.shape
    xf = x.reshape(batch, du * dv, h, w).astype(jnp.float32)
    p = jax.nn.softmax(xf, axis=1)
    ent = jnp.sum(-p * jnp.log(jnp.clip(p, eps, 1.0 - eps)), axis=1)
    return (ent / np.log(du * dv)).astype(x.dtype)


if __name__ == "__main__":
    # Case 1: clean path (C divides h*w exactly, zero padding).
    key = jax.random.PRNGKey(0)
    batch, du, dv, h, w = 2, 4, 4, 16, 16
    x = jax.random.normal(key, (batch, du, dv, h, w), dtype=jnp.float32)
    out = jax.block_until_ready(flow_entropy(x))
    assert out.shape == (batch, h, w)
    np.testing.assert_allclose(np.asarray(out), np.asarray(_flow_entropy_ref(x)),
                               rtol=1e-5, atol=1e-5)

    # Case 2: odd spatial size (exercises the minimal-pad fallback path).
    x2 = jax.random.normal(jax.random.PRNGKey(0), (1, 2, 2, 33, 33),
                           dtype=jnp.float32)
    out2 = jax.block_until_ready(flow_entropy(x2))
    assert out2.shape == (1, 33, 33)
    np.testing.assert_allclose(np.asarray(out2), np.asarray(_flow_entropy_ref(x2)),
                               rtol=1e-5, atol=1e-5)

    print("KERNEL_OK")
</pallas_src>

<mosaic_0001>
module attributes {stable_mosaic.version = 11 : i64} {
  func.func @_flow_entropy_kernel(%arg0: i32, %arg1: i32, %arg2: memref<1x16x1x256xf32, #tpu.memory_space<vmem>>, %arg3: memref<1x1x256xf32, #tpu.memory_space<vmem>>) attributes {dimension_semantics = [#tpu.dimension_semantics<parallel>, #tpu.dimension_semantics<parallel>], iteration_bounds = array<i64: 2, 1>, scalar_prefetch = 0 : i64, scratch_operands = 0 : i64, tpu.core_type = #tpu.core_type<tc>, window_params = [{transform_indices = @transform_0, window_bounds = array<i64: 1, 16, 1, 256>}, {transform_indices = @transform_1, window_bounds = array<i64: 1, 1, 256>}]} {
    %c0_i32 = arith.constant 0 : i32
    %c1_i32 = arith.constant 1 : i32
    %0 = arith.muli %c0_i32, %c1_i32 : i32
    %c0_i32_0 = arith.constant 0 : i32
    %1 = arith.addi %c0_i32_0, %0 : i32
    %c1_i32_1 = arith.constant 1 : i32
    %2 = arith.muli %1, %c1_i32_1 : i32
    %3 = tpu.assume_multiple %2, 1 : i32
    %c0 = arith.constant 0 : index
    %c0_2 = arith.constant 0 : index
    %4 = arith.index_cast %3 : i32 to index
    %c0_3 = arith.constant 0 : index
    %5 = vector.load %arg2[%c0, %c0_2, %4, %c0_3] : memref<1x16x1x256xf32, #tpu.memory_space<vmem>>, vector<1x1x1x256xf32>
    %6 = vector.shape_cast %5 : vector<1x1x1x256xf32> to vector<1x256xf32>
    %c1_i32_4 = arith.constant 1 : i32
    %c0_5 = arith.constant 0 : index
    %7 = arith.index_cast %c1_i32_4 : i32 to index
    %8 = arith.index_cast %3 : i32 to index
    %c0_6 = arith.constant 0 : index
    %9 = vector.load %arg2[%c0_5, %7, %8, %c0_6] : memref<1x16x1x256xf32, #tpu.memory_space<vmem>>, vector<1x1x1x256xf32>
    %10 = vector.shape_cast %9 : vector<1x1x1x256xf32> to vector<1x256xf32>
    %11 = arith.maximumf %6, %10 : vector<1x256xf32>
    %c2_i32 = arith.constant 2 : i32
    %c0_7 = arith.constant 0 : index
    %12 = arith.index_cast %c2_i32 : i32 to index
    %13 = arith.index_cast %3 : i32 to index
    %c0_8 = arith.constant 0 : index
    %14 = vector.load %arg2[%c0_7, %12, %13, %c0_8] : memref<1x16x1x256xf32, #tpu.memory_space<vmem>>, vector<1x1x1x256xf32>
    %15 = vector.shape_cast %14 : vector<1x1x1x256xf32> to vector<1x256xf32>
    %16 = arith.maximumf %11, %15 : vector<1x256xf32>
    %c3_i32 = arith.constant 3 : i32
    %c0_9 = arith.constant 0 : index
    %17 = arith.index_cast %c3_i32 : i32 to index
    %18 = arith.index_cast %3 : i32 to index
    %c0_10 = arith.constant 0 : index
    %19 = vector.load %arg2[%c0_9, %17, %18, %c0_10] : memref<1x16x1x256xf32, #tpu.memory_space<vmem>>, vector<1x1x1x256xf32>
    %20 = vector.shape_cast %19 : vector<1x1x1x256xf32> to vector<1x256xf32>
    %21 = arith.maximumf %16, %20 : vector<1x256xf32>
    %c4_i32 = arith.constant 4 : i32
    %c0_11 = arith.constant 0 : index
    %22 = arith.index_cast %c4_i32 : i32 to index
    %23 = arith.index_cast %3 : i32 to index
    %c0_12 = arith.constant 0 : index
    %24 = vector.load %arg2[%c0_11, %22, %23, %c0_12] : memref<1x16x1x256xf32, #tpu.memory_space<vmem>>, vector<1x1x1x256xf32>
    %25 = vector.shape_cast %24 : vector<1x1x1x256xf32> to vector<1x256xf32>
    %26 = arith.maximumf %21, %25 : vector<1x256xf32>
    %c5_i32 = arith.constant 5 : i32
    %c0_13 = arith.constant 0 : index
    %27 = arith.index_cast %c5_i32 : i32 to index
    %28 = arith.index_cast %3 : i32 to index
    %c0_14 = arith.constant 0 : index
    %29 = vector.load %arg2[%c0_13, %27, %28, %c0_14] : memref<1x16x1x256xf32, #tpu.memory_space<vmem>>, vector<1x1x1x256xf32>
    %30 = vector.shape_cast %29 : vector<1x1x1x256xf32> to vector<1x256xf32>
    %31 = arith.maximumf %26, %30 : vector<1x256xf32>
    %c6_i32 = arith.constant 6 : i32
    %c0_15 = arith.constant 0 : index
    %32 = arith.index_cast %c6_i32 : i32 to index
    %33 = arith.index_cast %3 : i32 to index
    %c0_16 = arith.constant 0 : index
    %34 = vector.load %arg2[%c0_15, %32, %33, %c0_16] : memref<1x16x1x256xf32, #tpu.memory_space<vmem>>, vector<1x1x1x256xf32>
    %35 = vector.shape_cast %34 : vector<1x1x1x256xf32> to vector<1x256xf32>
    %36 = arith.maximumf %31, %35 : vector<1x256xf32>
    %c7_i32 = arith.constant 7 : i32
    %c0_17 = arith.constant 0 : index
    %37 = arith.index_cast %c7_i32 : i32 to index
    %38 = arith.index_cast %3 : i32 to index
    %c0_18 = arith.constant 0 : index
    %39 = vector.load %arg2[%c0_17, %37, %38, %c0_18] : memref<1x16x1x256xf32, #tpu.memory_space<vmem>>, vector<1x1x1x256xf32>
    %40 = vector.shape_cast %39 : vector<1x1x1x256xf32> to vector<1x256xf32>
    %41 = arith.maximumf %36, %40 : vector<1x256xf32>
    %c8_i32 = arith.constant 8 : i32
    %c0_19 = arith.constant 0 : index
    %42 = arith.index_cast %c8_i32 : i32 to index
    %43 = arith.index_cast %3 : i32 to index
    %c0_20 = arith.constant 0 : index
    %44 = vector.load %arg2[%c0_19, %42, %43, %c0_20] : memref<1x16x1x256xf32, #tpu.memory_space<vmem>>, vector<1x1x1x256xf32>
    %45 = vector.shape_cast %44 : vector<1x1x1x256xf32> to vector<1x256xf32>
    %46 = arith.maximumf %41, %45 : vector<1x256xf32>
    %c9_i32 = arith.constant 9 : i32
    %c0_21 = arith.constant 0 : index
    %47 = arith.index_cast %c9_i32 : i32 to index
    %48 = arith.index_cast %3 : i32 to index
    %c0_22 = arith.constant 0 : index
    %49 = vector.load %arg2[%c0_21, %47, %48, %c0_22] : memref<1x16x1x256xf32, #tpu.memory_space<vmem>>, vector<1x1x1x256xf32>
    %50 = vector.shape_cast %49 : vector<1x1x1x256xf32> to vector<1x256xf32>
    %51 = arith.maximumf %46, %50 : vector<1x256xf32>
    %c10_i32 = arith.constant 10 : i32
    %c0_23 = arith.constant 0 : index
    %52 = arith.index_cast %c10_i32 : i32 to index
    %53 = arith.index_cast %3 : i32 to index
    %c0_24 = arith.constant 0 : index
    %54 = vector.load %arg2[%c0_23, %52, %53, %c0_24] : memref<1x16x1x256xf32, #tpu.memory_space<vmem>>, vector<1x1x1x256xf32>
    %55 = vector.shape_cast %54 : vector<1x1x1x256xf32> to vector<1x256xf32>
    %56 = arith.maximumf %51, %55 : vector<1x256xf32>
    %c11_i32 = arith.constant 11 : i32
    %c0_25 = arith.constant 0 : index
    %57 = arith.index_cast %c11_i32 : i32 to index
    %58 = arith.index_cast %3 : i32 to index
    %c0_26 = arith.constant 0 : index
    %59 = vector.load %arg2[%c0_25, %57, %58, %c0_26] : memref<1x16x1x256xf32, #tpu.memory_space<vmem>>, vector<1x1x1x256xf32>
    %60 = vector.shape_cast %59 : vector<1x1x1x256xf32> to vector<1x256xf32>
    %61 = arith.maximumf %56, %60 : vector<1x256xf32>
    %c12_i32 = arith.constant 12 : i32
    %c0_27 = arith.constant 0 : index
    %62 = arith.index_cast %c12_i32 : i32 to index
    %63 = arith.index_cast %3 : i32 to index
    %c0_28 = arith.constant 0 : index
    %64 = vector.load %arg2[%c0_27, %62, %63, %c0_28] : memref<1x16x1x256xf32, #tpu.memory_space<vmem>>, vector<1x1x1x256xf32>
    %65 = vector.shape_cast %64 : vector<1x1x1x256xf32> to vector<1x256xf32>
    %66 = arith.maximumf %61, %65 : vector<1x256xf32>
    %c13_i32 = arith.constant 13 : i32
    %c0_29 = arith.constant 0 : index
    %67 = arith.index_cast %c13_i32 : i32 to index
    %68 = arith.index_cast %3 : i32 to index
    %c0_30 = arith.constant 0 : index
    %69 = vector.load %arg2[%c0_29, %67, %68, %c0_30] : memref<1x16x1x256xf32, #tpu.memory_space<vmem>>, vector<1x1x1x256xf32>
    %70 = vector.shape_cast %69 : vector<1x1x1x256xf32> to vector<1x256xf32>
    %71 = arith.maximumf %66, %70 : vector<1x256xf32>
    %c14_i32 = arith.constant 14 : i32
    %c0_31 = arith.constant 0 : index
    %72 = arith.index_cast %c14_i32 : i32 to index
    %73 = arith.index_cast %3 : i32 to index
    %c0_32 = arith.constant 0 : index
    %74 = vector.load %arg2[%c0_31, %72, %73, %c0_32] : memref<1x16x1x256xf32, #tpu.memory_space<vmem>>, vector<1x1x1x256xf32>
    %75 = vector.shape_cast %74 : vector<1x1x1x256xf32> to vector<1x256xf32>
    %76 = arith.maximumf %71, %75 : vector<1x256xf32>
    %c15_i32 = arith.constant 15 : i32
    %c0_33 = arith.constant 0 : index
    %77 = arith.index_cast %c15_i32 : i32 to index
    %78 = arith.index_cast %3 : i32 to index
    %c0_34 = arith.constant 0 : index
    %79 = vector.load %arg2[%c0_33, %77, %78, %c0_34] : memref<1x16x1x256xf32, #tpu.memory_space<vmem>>, vector<1x1x1x256xf32>
    %80 = vector.shape_cast %79 : vector<1x1x1x256xf32> to vector<1x256xf32>
    %81 = arith.maximumf %76, %80 : vector<1x256xf32>
    %c15_i32_35 = arith.constant 15 : i32
    %cst = arith.constant 0.000000e+00 : f32
    %82 = vector.broadcast %cst : f32 to vector<1x256xf32>
    %c0_i32_36 = arith.constant 0 : i32
    %c0_37 = arith.constant 0 : index
    %83 = arith.index_cast %c0_i32_36 : i32 to index
    %84 = arith.index_cast %3 : i32 to index
    %c0_38 = arith.constant 0 : index
    %85 = vector.load %arg2[%c0_37, %83, %84, %c0_38] : memref<1x16x1x256xf32, #tpu.memory_space<vmem>>, vector<1x1x1x256xf32>
    %86 = vector.shape_cast %85 : vector<1x1x1x256xf32> to vector<1x256xf32>
    %87 = arith.subf %86, %81 : vector<1x256xf32>
    %88 = math.exp %87 : vector<1x256xf32>
    %89 = arith.addf %82, %88 : vector<1x256xf32>
    %90 = arith.mulf %88, %87 : vector<1x256xf32>
    %91 = arith.addf %82, %90 : vector<1x256xf32>
    %c1_i32_39 = arith.constant 1 : i32
    %c0_40 = arith.constant 0 : index
    %92 = arith.index_cast %c1_i32_39 : i32 to index
    %93 = arith.index_cast %3 : i32 to index
    %c0_41 = arith.constant 0 : index
    %94 = vector.load %arg2[%c0_40, %92, %93, %c0_41] : memref<1x16x1x256xf32, #tpu.memory_space<vmem>>, vector<1x1x1x256xf32>
    %95 = vector.shape_cast %94 : vector<1x1x1x256xf32> to vector<1x256xf32>
    %96 = arith.subf %95, %81 : vector<1x256xf32>
    %97 = math.exp %96 : vector<1x256xf32>
    %98 = arith.addf %89, %97 : vector<1x256xf32>
    %99 = arith.mulf %97, %96 : vector<1x256xf32>
    %100 = arith.addf %91, %99 : vector<1x256xf32>
    %c2_i32_42 = arith.constant 2 : i32
    %c0_43 = arith.constant 0 : index
    %101 = arith.index_cast %c2_i32_42 : i32 to index
    %102 = arith.index_cast %3 : i32 to index
    %c0_44 = arith.constant 0 : index
    %103 = vector.load %arg2[%c0_43, %101, %102, %c0_44] : memref<1x16x1x256xf32, #tpu.memory_space<vmem>>, vector<1x1x1x256xf32>
    %104 = vector.shape_cast %103 : vector<1x1x1x256xf32> to vector<1x256xf32>
    %105 = arith.subf %104, %81 : vector<1x256xf32>
    %106 = math.exp %105 : vector<1x256xf32>
    %107 = arith.addf %98, %106 : vector<1x256xf32>
    %108 = arith.mulf %106, %105 : vector<1x256xf32>
    %109 = arith.addf %100, %108 : vector<1x256xf32>
    %c3_i32_45 = arith.constant 3 : i32
    %c0_46 = arith.constant 0 : index
    %110 = arith.index_cast %c3_i32_45 : i32 to index
    %111 = arith.index_cast %3 : i32 to index
    %c0_47 = arith.constant 0 : index
    %112 = vector.load %arg2[%c0_46, %110, %111, %c0_47] : memref<1x16x1x256xf32, #tpu.memory_space<vmem>>, vector<1x1x1x256xf32>
    %113 = vector.shape_cast %112 : vector<1x1x1x256xf32> to vector<1x256xf32>
    %114 = arith.subf %113, %81 : vector<1x256xf32>
    %115 = math.exp %114 : vector<1x256xf32>
    %116 = arith.addf %107, %115 : vector<1x256xf32>
    %117 = arith.mulf %115, %114 : vector<1x256xf32>
    %118 = arith.addf %109, %117 : vector<1x256xf32>
    %c4_i32_48 = arith.constant 4 : i32
    %c0_49 = arith.constant 0 : index
    %119 = arith.index_cast %c4_i32_48 : i32 to index
    %120 = arith.index_cast %3 : i32 to index
    %c0_50 = arith.constant 0 : index
    %121 = vector.load %arg2[%c0_49, %119, %120, %c0_50] : memref<1x16x1x256xf32, #tpu.memory_space<vmem>>, vector<1x1x1x256xf32>
    %122 = vector.shape_cast %121 : vector<1x1x1x256xf32> to vector<1x256xf32>
    %123 = arith.subf %122, %81 : vector<1x256xf32>
    %124 = math.exp %123 : vector<1x256xf32>
    %125 = arith.addf %116, %124 : vector<1x256xf32>
    %126 = arith.mulf %124, %123 : vector<1x256xf32>
    %127 = arith.addf %118, %126 : vector<1x256xf32>
    %c5_i32_51 = arith.constant 5 : i32
    %c0_52 = arith.constant 0 : index
    %128 = arith.index_cast %c5_i32_51 : i32 to index
    %129 = arith.index_cast %3 : i32 to index
    %c0_53 = arith.constant 0 : index
    %130 = vector.load %arg2[%c0_52, %128, %129, %c0_53] : memref<1x16x1x256xf32, #tpu.memory_space<vmem>>, vector<1x1x1x256xf32>
    %131 = vector.shape_cast %130 : vector<1x1x1x256xf32> to vector<1x256xf32>
    %132 = arith.subf %131, %81 : vector<1x256xf32>
    %133 = math.exp %132 : vector<1x256xf32>
    %134 = arith.addf %125, %133 : vector<1x256xf32>
    %135 = arith.mulf %133, %132 : vector<1x256xf32>
    %136 = arith.addf %127, %135 : vector<1x256xf32>
    %c6_i32_54 = arith.constant 6 : i32
    %c0_55 = arith.constant 0 : index
    %137 = arith.index_cast %c6_i32_54 : i32 to index
    %138 = arith.index_cast %3 : i32 to index
    %c0_56 = arith.constant 0 : index
    %139 = vector.load %arg2[%c0_55, %137, %138, %c0_56] : memref<1x16x1x256xf32, #tpu.memory_space<vmem>>, vector<1x1x1x256xf32>
    %140 = vector.shape_cast %139 : vector<1x1x1x256xf32> to vector<1x256xf32>
    %141 = arith.subf %140, %81 : vector<1x256xf32>
    %142 = math.exp %141 : vector<1x256xf32>
    %143 = arith.addf %134, %142 : vector<1x256xf32>
    %144 = arith.mulf %142, %141 : vector<1x256xf32>
    %145 = arith.addf %136, %144 : vector<1x256xf32>
    %c7_i32_57 = arith.constant 7 : i32
    %c0_58 = arith.constant 0 : index
    %146 = arith.index_cast %c7_i32_57 : i32 to index
    %147 = arith.index_cast %3 : i32 to index
    %c0_59 = arith.constant 0 : index
    %148 = vector.load %arg2[%c0_58, %146, %147, %c0_59] : memref<1x16x1x256xf32, #tpu.memory_space<vmem>>, vector<1x1x1x256xf32>
    %149 = vector.shape_cast %148 : vector<1x1x1x256xf32> to vector<1x256xf32>
    %150 = arith.subf %149, %81 : vector<1x256xf32>
    %151 = math.exp %150 : vector<1x256xf32>
    %152 = arith.addf %143, %151 : vector<1x256xf32>
    %153 = arith.mulf %151, %150 : vector<1x256xf32>
    %154 = arith.addf %145, %153 : vector<1x256xf32>
    %c8_i32_60 = arith.constant 8 : i32
    %c0_61 = arith.constant 0 : index
    %155 = arith.index_cast %c8_i32_60 : i32 to index
    %156 = arith.index_cast %3 : i32 to index
    %c0_62 = arith.constant 0 : index
    %157 = vector.load %arg2[%c0_61, %155, %156, %c0_62] : memref<1x16x1x256xf32, #tpu.memory_space<vmem>>, vector<1x1x1x256xf32>
    %158 = vector.shape_cast %157 : vector<1x1x1x256xf32> to vector<1x256xf32>
    %159 = arith.subf %158, %81 : vector<1x256xf32>
    %160 = math.exp %159 : vector<1x256xf32>
    %161 = arith.addf %152, %160 : vector<1x256xf32>
    %162 = arith.mulf %160, %159 : vector<1x256xf32>
    %163 = arith.addf %154, %162 : vector<1x256xf32>
    %c9_i32_63 = arith.constant 9 : i32
    %c0_64 = arith.constant 0 : index
    %164 = arith.index_cast %c9_i32_63 : i32 to index
    %165 = arith.index_cast %3 : i32 to index
    %c0_65 = arith.constant 0 : index
    %166 = vector.load %arg2[%c0_64, %164, %165, %c0_65] : memref<1x16x1x256xf32, #tpu.memory_space<vmem>>, vector<1x1x1x256xf32>
    %167 = vector.shape_cast %166 : vector<1x1x1x256xf32> to vector<1x256xf32>
    %168 = arith.subf %167, %81 : vector<1x256xf32>
    %169 = math.exp %168 : vector<1x256xf32>
    %170 = arith.addf %161, %169 : vector<1x256xf32>
    %171 = arith.mulf %169, %168 : vector<1x256xf32>
    %172 = arith.addf %163, %171 : vector<1x256xf32>
    %c10_i32_66 = arith.constant 10 : i32
    %c0_67 = arith.constant 0 : index
    %173 = arith.index_cast %c10_i32_66 : i32 to index
    %174 = arith.index_cast %3 : i32 to index
    %c0_68 = arith.constant 0 : index
    %175 = vector.load %arg2[%c0_67, %173, %174, %c0_68] : memref<1x16x1x256xf32, #tpu.memory_space<vmem>>, vector<1x1x1x256xf32>
    %176 = vector.shape_cast %175 : vector<1x1x1x256xf32> to vector<1x256xf32>
    %177 = arith.subf %176, %81 : vector<1x256xf32>
    %178 = math.exp %177 : vector<1x256xf32>
    %179 = arith.addf %170, %178 : vector<1x256xf32>
    %180 = arith.mulf %178, %177 : vector<1x256xf32>
    %181 = arith.addf %172, %180 : vector<1x256xf32>
    %c11_i32_69 = arith.constant 11 : i32
    %c0_70 = arith.constant 0 : index
    %182 = arith.index_cast %c11_i32_69 : i32 to index
    %183 = arith.index_cast %3 : i32 to index
    %c0_71 = arith.constant 0 : index
    %184 = vector.load %arg2[%c0_70, %182, %183, %c0_71] : memref<1x16x1x256xf32, #tpu.memory_space<vmem>>, vector<1x1x1x256xf32>
    %185 = vector.shape_cast %184 : vector<1x1x1x256xf32> to vector<1x256xf32>
    %186 = arith.subf %185, %81 : vector<1x256xf32>
    %187 = math.exp %186 : vector<1x256xf32>
    %188 = arith.addf %179, %187 : vector<1x256xf32>
    %189 = arith.mulf %187, %186 : vector<1x256xf32>
    %190 = arith.addf %181, %189 : vector<1x256xf32>
    %c12_i32_72 = arith.constant 12 : i32
    %c0_73 = arith.constant 0 : index
    %191 = arith.index_cast %c12_i32_72 : i32 to index
    %192 = arith.index_cast %3 : i32 to index
    %c0_74 = arith.constant 0 : index
    %193 = vector.load %arg2[%c0_73, %191, %192, %c0_74] : memref<1x16x1x256xf32, #tpu.memory_space<vmem>>, vector<1x1x1x256xf32>
    %194 = vector.shape_cast %193 : vector<1x1x1x256xf32> to vector<1x256xf32>
    %195 = arith.subf %194, %81 : vector<1x256xf32>
    %196 = math.exp %195 : vector<1x256xf32>
    %197 = arith.addf %188, %196 : vector<1x256xf32>
    %198 = arith.mulf %196, %195 : vector<1x256xf32>
    %199 = arith.addf %190, %198 : vector<1x256xf32>
    %c13_i32_75 = arith.constant 13 : i32
    %c0_76 = arith.constant 0 : index
    %200 = arith.index_cast %c13_i32_75 : i32 to index
    %201 = arith.index_cast %3 : i32 to index
    %c0_77 = arith.constant 0 : index
    %202 = vector.load %arg2[%c0_76, %200, %201, %c0_77] : memref<1x16x1x256xf32, #tpu.memory_space<vmem>>, vector<1x1x1x256xf32>
    %203 = vector.shape_cast %202 : vector<1x1x1x256xf32> to vector<1x256xf32>
    %204 = arith.subf %203, %81 : vector<1x256xf32>
    %205 = math.exp %204 : vector<1x256xf32>
    %206 = arith.addf %197, %205 : vector<1x256xf32>
    %207 = arith.mulf %205, %204 : vector<1x256xf32>
    %208 = arith.addf %199, %207 : vector<1x256xf32>
    %c14_i32_78 = arith.constant 14 : i32
    %c0_79 = arith.constant 0 : index
    %209 = arith.index_cast %c14_i32_78 : i32 to index
    %210 = arith.index_cast %3 : i32 to index
    %c0_80 = arith.constant 0 : index
    %211 = vector.load %arg2[%c0_79, %209, %210, %c0_80] : memref<1x16x1x256xf32, #tpu.memory_space<vmem>>, vector<1x1x1x256xf32>
    %212 = vector.shape_cast %211 : vector<1x1x1x256xf32> to vector<1x256xf32>
    %213 = arith.subf %212, %81 : vector<1x256xf32>
    %214 = math.exp %213 : vector<1x256xf32>
    %215 = arith.addf %206, %214 : vector<1x256xf32>
    %216 = arith.mulf %214, %213 : vector<1x256xf32>
    %217 = arith.addf %208, %216 : vector<1x256xf32>
    %c15_i32_81 = arith.constant 15 : i32
    %c0_82 = arith.constant 0 : index
    %218 = arith.index_cast %c15_i32_81 : i32 to index
    %219 = arith.index_cast %3 : i32 to index
    %c0_83 = arith.constant 0 : index
    %220 = vector.load %arg2[%c0_82, %218, %219, %c0_83] : memref<1x16x1x256xf32, #tpu.memory_space<vmem>>, vector<1x1x1x256xf32>
    %221 = vector.shape_cast %220 : vector<1x1x1x256xf32> to vector<1x256xf32>
    %222 = arith.subf %221, %81 : vector<1x256xf32>
    %223 = math.exp %222 : vector<1x256xf32>
    %224 = arith.addf %215, %223 : vector<1x256xf32>
    %225 = arith.mulf %223, %222 : vector<1x256xf32>
    %226 = arith.addf %217, %225 : vector<1x256xf32>
    %c16_i32 = arith.constant 16 : i32
    %227 = tpu.reciprocal %224 {approx = true} : vector<1x256xf32> -> vector<1x256xf32>
    %228 = arith.mulf %224, %227 : vector<1x256xf32>
    %cst_84 = arith.constant 2.000000e+00 : f32
    %229 = vector.broadcast %cst_84 : f32 to vector<1x256xf32>
    %230 = arith.subf %229, %228 : vector<1x256xf32>
    %231 = arith.mulf %227, %230 : vector<1x256xf32>
    %232 = math.log %224 : vector<1x256xf32>
    %233 = arith.mulf %226, %231 : vector<1x256xf32>
    %234 = arith.subf %232, %233 : vector<1x256xf32>
    %cst_85 = arith.constant 0.360673755 : f32
    %235 = vector.broadcast %cst_85 : f32 to vector<1x256xf32>
    %236 = arith.mulf %234, %235 : vector<1x256xf32>
    %c0_86 = arith.constant 0 : index
    %237 = arith.index_cast %3 : i32 to index
    %c0_87 = arith.constant 0 : index
    %238 = vector.load %arg3[%c0_86, %237, %c0_87] : memref<1x1x256xf32, #tpu.memory_space<vmem>>, vector<1x1x256xf32>
    %239 = vector.shape_cast %238 : vector<1x1x256xf32> to vector<1x256xf32>
    %240 = vector.shape_cast %236 : vector<1x256xf32> to vector<1x1x256xf32>
    tpu.vector_store %arg3[%c0_86, %237, %c0_87], %240 {strides = array<i32>} : memref<1x1x256xf32, #tpu.memory_space<vmem>>, vector<1x1x256xf32>,
    %c1_i32_88 = arith.constant 1 : i32
    return
  }
  func.func @transform_0(%arg0: i32, %arg1: i32) -> (i32, i32, i32, i32) {
    %c0_i32 = arith.constant 0 : i32
    %c0_i32_0 = arith.constant 0 : i32
    %c0_i32_1 = arith.constant 0 : i32
    return %arg0, %c0_i32, %arg1, %c0_i32_0 : i32, i32, i32, i32
  }
  func.func @transform_1(%arg0: i32, %arg1: i32) -> (i32, i32, i32) {
    %c0_i32 = arith.constant 0 : i32
    %c0_i32_0 = arith.constant 0 : i32
    return %arg0, %arg1, %c0_i32 : i32, i32, i32
  }
}

</mosaic_0001>

<bundles_post_ra>
// kernel: tpu_custom_call.1
= control target key start
LH: loop header
LB: loop body
LE: loop exit
PB: predicated region body
PF: predicated region fallthrough
CT: control target
= control target key end

     0   :  { %6 = vsyncpa [#allocation3], 0  ;;  %s907_s0 = inlined_call_operand.hbm [shape: f32[2,16,1,256], index: 0, kind: input, shape index: {}]   ;;  %s908_s1 = inlined_call_operand.hbm [shape: f32[2,1,256], index: 1, kind: output, shape index: {}]  }
   0x1   :  { %8 = vsyncpa [#allocation3 + $0x1], 0 }
   0x2   :  { %9 = vsyncpa [#allocation4], 0 }
   0x3   :  { %11 = vsyncpa [#allocation4 + $0x1], 0  ;;  %s703_s6 = smov 0   ;;  %s705_s7 = smov 0  }
   0x4   :  { %s707_s8 = smov 0   ;;  %s709_s9 = smov 0  }
   0x5   :  { %s711_s10 = smov 0   ;;  %s713_s11 = smov 0  }
   0x6 LB: > { %s443_s12 = sadd.s32 4294967295, %s687_s11   ;;  %s444_s13 = sadd.s32 4294967294, %s687_s11   ;;  %s687_s11 = sphi %s713_s11, %s17_s11   ;;  %s683_s10 = sphi %s711_s10, %s923_s10   ;;  %s679_s9 = sphi %s709_s9, %s922_s9   ;;  %s675_s8 = sphi %s707_s8, %s921_s8   ;;  %s671_s7 = sphi %s705_s7, %s920_s7   ;;  %s667_s6 = sphi %s703_s6, %s919_s6  }
   0x7   : > { %s29_s14 = sadd.s32 1, %s683_s10  ;;  %s38_s15 = sadd.s32 1, %s675_s8 }
   0x8   : > { %p31_p0 = scmp.ge.s32.totalorder %s29_s14, 2  ;;  %p45_p1 = scmp.ne.s32.totalorder %s675_s8, %s671_s7 }
   0x9   : > { %p46_p2 = scmp.eq.s32.totalorder %s687_s11, 0  ;;  %p51_p3 = scmp.ne.s32.totalorder %s671_s7, %s667_s6 }
   0xa   : > { %s925_s14 = smov (%p31_p0, %s29_s14), 0  ;;  %p52_p5 = scmp.eq.s32.totalorder %s443_s12, 0 }
   0xb   : > { %p744_p4 = por %p46_p2, %p45_p1  ;;  %s33_s17 = ssub.s32 %s683_s10, %s925_s14 }
   0xc   : > { %p77_p6 = scmp.eq.s32.totalorder %s443_s12, 1  ;;  %p36_p7 = scmp.eq.s32.totalorder %s33_s17, 0 }
   0xd   : > { %p750_p8 = por %p52_p5, %p51_p3  ;;  %p83_p10 = scmp.eq.s32.totalorder %s444_s13, 1 }
   0xe   : > { %p754_p9 = por %p77_p6, %p45_p1  ;;  %p487_p13 = scmp.lt.s32.totalorder %s687_s11, 2 }
   0xf   : > { %s759_s20 = scalar_select %p36_p7, %s675_s8, %s38_s15  }
  0x10   : > { %s912_s19 = scalar_select %p754_p9, 1, 0 }
  0x11   : > { %p761_p11 = por %p83_p10, %p51_p3  ;;  %s103_s22 = sand.u32 1, %s675_s8  }
  0x12   : > { %s447_s23 = sshll.u32 %s103_s22, 5  ;;  %s473_s24 = sshll.u32 %s683_s10, 9 }
  0x13   : > { %s913_s21 = scalar_select %p761_p11, 1, 0 }
  0x14   : > { %s772_s27 = scalar_lea.hbm %s907_s0, %s473_s24  ;;  %s107_s28 = scalar_lea.vmem [#allocation2], %s447_s23 }
  0x15   : > { %s116_s29 = sshll.u32 %s107_s28, 4  ;;  %p778_p0 = pnand %p487_p13, %p744_p4  ;;  %s774_s29 = int_to_ptr.vmem [resolvable:$true] %s116_s29 }
  0x16   : > { %s783_s2 = scalar_lea.sflag [#allocation3], %s103_s22  ;;  %s575_s3 = scalar_lea.hbm %s772_s27, 512 }
  0x17   : > { %p576_p2 = scmp.ne.s32.totalorder %s772_s27, %s575_s3  ;;  %p577_p3 = pneg %p778_p0 }
  0x18   : > { %s580_s12 = scalar_lea.hbm %s907_s0, 1024  ;;  %p581_p4 = scmp.lt.u32.totalorder %s772_s27, %s907_s0 }
  0x19   : > { %p578_p5 = pnand %p577_p3, %p576_p2  ;;  %p582_p7 = scmp.lt.u32.totalorder %s580_s12, %s575_s3 }
  0x1a   : > { %p584_p13 = scmp.lt.u32.totalorder %s575_s3, %s772_s27 }
  0x1b   : > { %p579_p6 = pneg %p578_p5  ;;  %p583_p10 = por %p582_p7, %p581_p4 }
  0x1d   : > { %p585_p12 = por %p584_p13, %p583_p10 }
  0x1f   : > { %p586_p1 = pnand %p585_p12, %p579_p6 }
  0x21   : > { %589 = shalt.err (!%p586_p1)
}
  0x22   : > { %s590_s16 = scalar_lea.vmem %s774_s29, 512  ;;  %s689_s17 = smov [#allocation2]  }
  0x23   : > { %p591_p2 = scmp.ne.s32.totalorder %s774_s29, %s590_s16  ;;  %s595_s22 = sshll.u32 %s689_s17, 4  ;;  %s596_s22 = int_to_ptr.vmem [resolvable:$false] %s595_s22 }
  0x24   : > { %s597_s23 = scalar_lea.vmem %s596_s22, 1024  ;;  %p598_p9 = scmp.lt.s32.totalorder %s774_s29, %s596_s22 }
  0x25   : > { %p593_p5 = pnand %p591_p2, %p577_p3  ;;  %p599_p4 = scmp.lt.s32.totalorder %s597_s23, %s590_s16 }
  0x27   : > { %p594_p11 = pneg %p593_p5  ;;  %p600_p7 = por %p599_p4, %p598_p9 }
  0x29   : > { %p601_p10 = pnand %p600_p7, %p594_p11 }
  0x2b   : > { %604 = shalt.err (!%p601_p10)
}
  0x2c   : > { %s690_s24 = smov 32   ;;  %s691_s25 = smov 2  }
  0x2d   : > { %482 = dma.hbm_to_vmem [thread:$0]  (!%p778_p0), %s772_s27, 512, %s774_s29, %s783_s2, %s690_s24, %s690_s24, %s691_s25  }
  0x2e   : > { %p124_p12 = scmp.lt.s32.totalorder %s687_s11, 3  ;;  %p915_p1 = scmp.ge.s32.totalorder %s687_s11, 1 }
  0x30   : > { %p125_p3 = pnand %p915_p1, %p124_p12 }
  0x31   : > { %s815_s26 = sand.u32 (!%p125_p3), 1, %s671_s7  }
  0x32   : > { %128 = sbr.rel (%p125_p3) target bundleno = 172 (0xac), region = 24  ;;  %s451_s28 = sshll.u32 (!%p125_p3), %s815_s26, 5 }
  0x33   : > { %s131_s3 = scalar_lea.sflag (!%p125_p3), [#allocation3], %s815_s26  ;;  %s819_s4 = scalar_lea.vmem (!%p125_p3), [#allocation2], %s451_s28 }
  0x39   : > { %658 = dma.done.wait (%p750_p8), %s131_s3, 512  }
  0x3a   : > { %660 = vsyncadd (%p750_p8), %s131_s3, 4294966784  ;;  %v155_v0 = vld [vmem:[%s819_s4] sm:$0x3]  ;;  %v453_v1 = vld [vmem:[%s819_s4 + $0x2] sm:$0x3]  ;;  %s452_s18 = sshll.u32 %s815_s26, 1 }
  0x3b   : > { %v454_v2 = vld [vmem:[%s819_s4 + $0x4] sm:$0x3]  ;;  %v159_v3 = vmax.f32 %v155_v0, %v453_v1  ;;  %v455_v4 = vld [vmem:[%s819_s4 + $0x6] sm:$0x3]  ;;  %v456_v6 = vld [vmem:[%s819_s4 + $0x8] sm:$0x3] }
  0x3c   : > { %v457_v8 = vld [vmem:[%s819_s4 + $0xa] sm:$0x3]  ;;  %v458_v10 = vld [vmem:[%s819_s4 + $0xc] sm:$0x3]  ;;  %v459_v12 = vld [vmem:[%s819_s4 + $0xe] sm:$0x3] }
  0x3d   : > { %v163_v5 = vmax.f32 %v159_v3, %v454_v2  ;;  %v460_v14 = vld [vmem:[%s819_s4 + $0x10] sm:$0x3]  ;;  %v461_v16 = vld [vmem:[%s819_s4 + $0x12] sm:$0x3]  ;;  %v462_v18 = vld [vmem:[%s819_s4 + $0x14] sm:$0x3] }
  0x3e   : > { %v463_v20 = vld [vmem:[%s819_s4 + $0x16] sm:$0x3]  ;;  %v464_v22 = vld [vmem:[%s819_s4 + $0x18] sm:$0x3]  ;;  %v465_v24 = vld [vmem:[%s819_s4 + $0x1a] sm:$0x3] }
  0x3f   : > { %v167_v7 = vmax.f32 %v163_v5, %v455_v4  ;;  %v466_v26 = vld [vmem:[%s819_s4 + $0x1c] sm:$0x3]  ;;  %v841_v28 = vld [vmem:[%s819_s4 + $0x1e] sm:$0x3]  ;;  %s152_s27 = scalar_lea.vmem [#allocation5], %s452_s18  ;;  %s474_s30 = sshll.u32 %s679_s9, 5 }
  0x40   : > { %s344_s29 = sshll.u32 %s152_s27, 4  ;;  %s860_s12 = scalar_lea.hbm %s908_s1, %s474_s30  ;;  %s855_s29 = int_to_ptr.vmem [resolvable:$true] %s344_s29 }
  0x41   : > { %v171_v9 = vmax.f32 %v167_v7, %v456_v6  ;;  %s328_s13 = scalar_lea.sflag [#allocation4], %s815_s26  ;;  %s605_s15 = scalar_lea.vmem %s855_s29, 32 }
  0x42   : > { %p606_p8 = scmp.ne.s32.totalorder %s855_s29, %s605_s15  ;;  %p916_p9 = scmp.ne.s32.totalorder %s912_s19, 0 }
  0x43   : > { %v175_v11 = vmax.f32 %v171_v9, %v457_v8  ;;  %s692_s9 = smov [#allocation5]  }
  0x44   : > { %p607_p11 = pnand %p606_p8, %p916_p9  ;;  %s609_s16 = sshll.u32 %s692_s9, 4  ;;  %s610_s16 = int_to_ptr.vmem [resolvable:$false] %s609_s16 }
  0x45   : > { %v179_v13 = vmax.f32 %v175_v11, %v458_v10  ;;  %s611_s17 = scalar_lea.vmem %s610_s16, 64  ;;  %p612_p6 = scmp.lt.s32.totalorder %s855_s29, %s610_s16 }
  0x46   : > { %p608_p0 = pneg %p607_p11  ;;  %p613_p13 = scmp.lt.s32.totalorder %s611_s17, %s605_s15 }
  0x47   : > { %v183_v15 = vmax.f32 %v179_v13, %v459_v12 }
  0x48   : > { %p614_p2 = por %p613_p13, %p612_p6 }
  0x49   : > { %v187_v17 = vmax.f32 %v183_v15, %v460_v14 }
  0x4a   : > { %p615_p5 = pnand %p614_p2, %p608_p0 }
  0x4b   : > { %v191_v19 = vmax.f32 %v187_v17, %v461_v16 }
  0x4d   : > { %v195_v21 = vmax.f32 %v191_v19, %v462_v18 }
  0x4f   : > { %v199_v23 = vmax.f32 %v195_v21, %v463_v20 }
  0x51   : > { %v203_v25 = vmax.f32 %v199_v23, %v464_v22 }
  0x53   : > { %v207_v27 = vmax.f32 %v203_v25, %v465_v24 }
  0x55   : > { %v211_v29 = vmax.f32 %v207_v27, %v466_v26 }
  0x57   : > { %v215_v30 = vmax.f32 %v211_v29, %v841_v28 }
  0x59   : > { %v216_v31 = vsub.f32 %v155_v0, %v215_v30  ;;  %v222_v32 = vsub.f32 %v453_v1, %v215_v30  ;;  %v228_v33 = vsub.f32 %v454_v2, %v215_v30  ;;  %v234_v34 = vsub.f32 %v455_v4, %v215_v30 }
  0x5a   : > { %v240_v35 = vsub.f32 %v456_v6, %v215_v30  ;;  %v246_v40 = vsub.f32 %v457_v8, %v215_v30  ;;  %v252_v42 = vsub.f32 %v458_v10, %v215_v30  ;;  %v258_v44 = vsub.f32 %v459_v12, %v215_v30 }
  0x5b   : > { %v217_v36 = vmul.f32 1.442695, %v216_v31  ;;  %v223_v37 = vmul.f32 1.442695, %v222_v32  ;;  %v229_v38 = vmul.f32 1.442695, %v228_v33  ;;  %v264_v46 = vsub.f32 %v460_v14, %v215_v30 }
  0x5c   : > { %v235_v39 = vmul.f32 1.442695, %v234_v34  ;;  %v241_v41 = vmul.f32 1.442695, %v240_v35  ;;  %v247_v43 = vmul.f32 1.442695, %v246_v40  ;;  %v270_v48 = vsub.f32 %v461_v16, %v215_v30 }
  0x5d   : > { %539 = vpow2.f32 %v217_v36  ;;  %v253_v45 = vmul.f32 1.442695, %v252_v42  ;;  %v259_v47 = vmul.f32 1.442695, %v258_v44  ;;  %v265_v49 = vmul.f32 1.442695, %v264_v46 }
  0x5e   : > { %541 = vpow2.f32 %v223_v37  ;;  %v844_v50 = vsub.f32 %v462_v18, %v215_v30  ;;  %v271_v54 = vmul.f32 1.442695, %v270_v48  ;;  %v846_v55 = vsub.f32 %v463_v20, %v215_v30 }
  0x5f   : > { %543 = vpow2.f32 %v229_v38  ;;  %v288_v62 = vsub.f32 %v464_v22, %v215_v30  ;;  %v294_v4 = vsub.f32 %v465_v24, %v215_v30  ;;  %v300_v10 = vsub.f32 %v466_v26, %v215_v30 }
  0x60   : > { %545 = vpow2.f32 %v235_v39  ;;  %v277_v61 = vmul.f32 1.442695, %v844_v50  ;;  %v283_v3 = vmul.f32 1.442695, %v846_v55  ;;  %v306_v16 = vsub.f32 %v841_v28, %v215_v30 }
  0x61   : > { %547 = vpow2.f32 %v241_v41  ;;  %v289_v9 = vmul.f32 1.442695, %v288_v62  ;;  %v295_v15 = vmul.f32 1.442695, %v294_v4  ;;  %v301_v21 = vmul.f32 1.442695, %v300_v10 }
  0x62   : > { %549 = vpow2.f32 %v247_v43  ;;  %v307_v26 = vmul.f32 1.442695, %v306_v16 }
  0x63   : > { %551 = vpow2.f32 %v253_v45 }
  0x64   : > { %553 = vpow2.f32 %v259_v47 }
  0x65   : > { %555 = vpow2.f32 %v265_v49 }
  0x66   : > { %557 = vpow2.f32 %v271_v54 }
  0x67   : > { %v540_v51 = vpop.eup %539  ;;  %559 = vpow2.f32 %v277_v61 }
  0x68   : > { %v542_v52 = vpop.eup %541  ;;  %v220_v53 = vmul.f32 %v540_v51, %v216_v31  ;;  %561 = vpow2.f32 %v283_v3  ;;  %v322_v3 = vlaneseq }
  0x69   : > { %v544_v56 = vpop.eup %543  ;;  %v225_v57 = vadd.f32 %v542_v52, %v540_v51  ;;  %v226_v58 = vmul.f32 %v542_v52, %v222_v32  ;;  %563 = vpow2.f32 %v289_v9 }
  0x6a   : > { %v546_v59 = vpop.eup %545  ;;  %v232_v60 = vmul.f32 %v544_v56, %v228_v33  ;;  %565 = vpow2.f32 %v295_v15  ;;  %vm324_vm0 = vcmp.lt.s32.totalorder %v322_v3, 256 }
  0x6b   : > { %v227_v63 = vadd.f32 %v226_v58, %v220_v53  ;;  %v231_v0 = vadd.f32 %v544_v56, %v225_v57  ;;  %v238_v1 = vmul.f32 %v546_v59, %v234_v34  ;;  %v548_v2 = vpop.eup %547  ;;  %567 = vpow2.f32 %v301_v21 }
  0x6c   : > { %v244_v7 = vmul.f32 %v548_v2, %v240_v35  ;;  %v550_v8 = vpop.eup %549  ;;  %569 = vpow2.f32 %v307_v26 }
  0x6d   : > { %v233_v5 = vadd.f32 %v232_v60, %v227_v63  ;;  %v237_v6 = vadd.f32 %v546_v59, %v231_v0  ;;  %v250_v13 = vmul.f32 %v550_v8, %v246_v40  ;;  %v552_v14 = vpop.eup %551 }
  0x6e   : > { %v256_v19 = vmul.f32 %v552_v14, %v252_v42  ;;  %v554_v20 = vpop.eup %553 }
  0x6f   : > { %v239_v11 = vadd.f32 %v238_v1, %v233_v5  ;;  %v243_v12 = vadd.f32 %v548_v2, %v237_v6  ;;  %v262_v24 = vmul.f32 %v554_v20, %v258_v44  ;;  %v556_v25 = vpop.eup %555 }
  0x70   : > { %v268_v31 = vmul.f32 %v556_v25, %v264_v46  ;;  %v558_v32 = vpop.eup %557 }
  0x71   : > { %v245_v17 = vadd.f32 %v244_v7, %v239_v11  ;;  %v249_v18 = vadd.f32 %v550_v8, %v243_v12  ;;  %v560_v28 = vpop.eup %559  ;;  %v274_v30 = vmul.f32 %v558_v32, %v270_v48 }
  0x72   : > { %v562_v37 = vpop.eup %561  ;;  %v280_v41 = vmul.f32 %v560_v28, %v844_v50 }
  0x73   : > { %v251_v22 = vadd.f32 %v250_v13, %v245_v17  ;;  %v255_v23 = vadd.f32 %v552_v14, %v249_v18  ;;  %v564_v39 = vpop.eup %563  ;;  %v286_v47 = vmul.f32 %v562_v37, %v846_v55 }
  0x74   : > { %v566_v43 = vpop.eup %565  ;;  %v292_v53 = vmul.f32 %v564_v39, %v288_v62 }
  0x75   : > { %v257_v27 = vadd.f32 %v256_v19, %v251_v22  ;;  %v261_v29 = vadd.f32 %v554_v20, %v255_v23  ;;  %v568_v45 = vpop.eup %567  ;;  %v298_v57 = vmul.f32 %v566_v43, %v294_v4 }
  0x76   : > { %v570_v51 = vpop.eup %569  ;;  %v304_v50 = vmul.f32 %v568_v45, %v300_v10 }
  0x77   : > { %v263_v33 = vadd.f32 %v262_v24, %v257_v27  ;;  %v267_v34 = vadd.f32 %v556_v25, %v261_v29  ;;  %v310_v60 = vmul.f32 %v570_v51, %v306_v16 }
  0x79   : > { %v269_v35 = vadd.f32 %v268_v31, %v263_v33  ;;  %v273_v36 = vadd.f32 %v558_v32, %v267_v34 }
  0x7b   : > { %v279_v38 = vadd.f32 %v560_v28, %v273_v36  ;;  %v275_v40 = vadd.f32 %v274_v30, %v269_v35 }
  0x7d   : > { %v285_v42 = vadd.f32 %v562_v37, %v279_v38  ;;  %v281_v46 = vadd.f32 %v280_v41, %v275_v40 }
  0x7f   : > { %v291_v44 = vadd.f32 %v564_v39, %v285_v42  ;;  %v287_v52 = vadd.f32 %v286_v47, %v281_v46 }
  0x81   : > { %v297_v49 = vadd.f32 %v566_v43, %v291_v44  ;;  %v293_v56 = vadd.f32 %v292_v53, %v287_v52 }
  0x83   : > { %v303_v48 = vadd.f32 %v568_v45, %v297_v49  ;;  %v299_v58 = vadd.f32 %v298_v57, %v293_v56 }
  0x85   : > { %v309_v54 = vadd.f32 %v570_v51, %v303_v48  ;;  %v305_v59 = vadd.f32 %v304_v50, %v299_v58 }
  0x87   : > { %571 = vrcp.f32 %v309_v54  ;;  %v311_v55 = vadd.f32 %v310_v60, %v305_v59 }
  0x88   : > { %573 = vlog2.f32 %v309_v54 }
  0x91   : > { %v572_v61 = vpop.eup %571 }
  0x92   : > { %v313_v63 = vmul.f32 %v572_v61, %v309_v54  ;;  %v574_v0 = vpop.eup %573 }
  0x93   : > { %v317_v62 = vmul.f32 0.6931472, %v574_v0 }
  0x94   : > { %v314_v1 = vsub.f32 2.0, %v313_v63 }
  0x96   : > { %v315_v2 = vmul.f32 %v572_v61, %v314_v1 }
  0x98   : > { %v318_v5 = vmul.f32 %v315_v2, %v311_v55 }
  0x9a   : > { %v319_v4 = vsub.f32 %v317_v62, %v318_v5 }
  0x9c   : > { %v320_v6 = vmul.f32 0.36067376, %v319_v4 }
  0x9e   : > { %326 = vst.msk [vmem:[%s152_s27] sm:$0x3] %vm324_vm0, %v320_v6 }
  0x9f   : > { %618 = shalt.err (!%p615_p5)
}
  0xa0   : > { %s619_s22 = scalar_lea.hbm %s860_s12, 32  ;;  %s623_s25 = scalar_lea.hbm %s908_s1, 64 }
  0xa1   : > { %p620_p4 = scmp.ne.s32.totalorder %s860_s12, %s619_s22  ;;  %p624_p12 = scmp.lt.u32.totalorder %s860_s12, %s908_s1 }
  0xa2   : > { %p625_p1 = scmp.lt.u32.totalorder %s623_s25, %s619_s22  ;;  %p627_p8 = scmp.lt.u32.totalorder %s619_s22, %s860_s12 }
  0xa3   : > { %p621_p7 = pnand %p620_p4, %p916_p9 }
  0xa4   : > { %p626_p3 = por %p625_p1, %p624_p12 }
  0xa5   : > { %p622_p10 = pneg %p621_p7 }
  0xa6   : > { %p628_p11 = por %p627_p8, %p626_p3 }
  0xa8   : > { %p629_p0 = pnand %p628_p11, %p622_p10 }
  0xaa   : > { %632 = shalt.err (!%p629_p0)
}
  0xab   : > { %477 = dma.vmem_to_hbm [thread:$0]  (%p916_p9), %s855_s29, 32, %s860_s12, %s328_s13  }
  0xac PF: > { %s356_s3 = sand.u32 1, %s667_s6   ;;  %p917_p6 = scmp.ne.s32.totalorder %s913_s21, 0 }
  0xad   : > { %p918_p13 = scmp.ge.s32.totalorder %s687_s11, 2  ;;  %s357_s4 = scalar_lea.sflag [#allocation4], %s356_s3 }
  0xaf   : > { %p484_p2 = pnand %p918_p13, %p917_p6 }
  0xb1   : > { %662 = dma.done.wait (!%p484_p2), %s357_s4, 32  }
  0xb2   : > { %664 = vsyncadd (!%p484_p2), %s357_s4, 4294967264  ;;  %s17_s11 = sadd.s32 1, %s687_s11   ;;  %s919_s6 = smov %s671_s7 }
  0xb3   : > { %p14_p5 = scmp.ge.s32.totalorder %s17_s11, 4   ;;  %s920_s7 = smov %s675_s8 }
  0xb4   : > { %s921_s8 = smov %s759_s20  ;;  %s922_s9 = smov %s683_s10 }
  0xb5   : > { %s923_s10 = smov %s925_s14  ;;  %16 = sbr.rel (!%p14_p5) target bundleno = 6 (0x6), region = 86 }
  0xbc   :  { %362 = vsyncpa [#allocation3], 1 }
  0xbd   :  { %364 = vsyncpa [#allocation3 + $0x1], 1 }
  0xbe   :  { %365 = vsyncpa [#allocation4], 1 }
  0xbf   :  { %367 = vsyncpa [#allocation4 + $0x1], 1 }

</bundles_post_ra>
